<compile_context>
chip_gen: v7x
topology: tpu7x:2x2x1
jax: 0.10.0
libtpu: 0.0.40
codegen_flags: <defaults>
</compile_context>

<pallas_src>
import jax
import jax.numpy as jnp
from jax.experimental import pallas as pl
from jax.experimental.pallas import tpu as pltpu

THRESHOLD = 0.1
VALUE = 20.0

_LANES = 512                 # lane-dense last dim (multiple of 128)
_SUBLANES = 8                # f32 sublane packing
_CHUNK = _LANES * _SUBLANES  # 4096 elems = one minimal (8, 512) f32 slab
_MAX_TILE_ROWS = 2048        # 2048 x 512 f32 = 4 MiB per buffer
_SMALL_N = 1 << 16           # below this, fused XLA where() beats kernel launch


def _threshold_kernel(x_ref, o_ref):
    x = x_ref[...]
    # torch.nn.Threshold: y = x if x > threshold else value
    # (NaN > threshold is False -> NaN maps to VALUE, matching torch)
    o_ref[...] = jnp.where(x > THRESHOLD, x, jnp.asarray(VALUE, o_ref.dtype))


def _round_up(a: int, b: int) -> int:
    return ((a + b - 1) // b) * b


def threshold_pallas(x: jax.Array) -> jax.Array:
    orig_shape = x.shape
    dtype = x.dtype
    n = x.size

    # Tiny-input bypass: kernel launch + layout plumbing would dwarf the math.
    if n < _SMALL_N:
        return jnp.where(x > THRESHOLD, x, jnp.asarray(VALUE, dtype))

    flat = x.reshape(-1)
    bulk_n = (n // _CHUNK) * _CHUNK      # largest (8, 512)-aligned prefix
    tail_n = n - bulk_n

    bulk = flat if tail_n == 0 else flat[:bulk_n]
    rows = bulk_n // _LANES              # multiple of 8
    x2d = bulk.reshape(rows, _LANES)     # lane-dense 2D slab, no padding

    # Tile sizing: up to 4 MiB tiles to amortize per-step overhead, but keep
    # the grid >= 2 steps so v7x's two TensorCores both get a share of this
    # DMA-bound stream.
    tile_rows = min(_MAX_TILE_ROWS, rows)
    if rows >= 2 * _SUBLANES:
        tile_rows = min(tile_rows, _round_up(pl.cdiv(rows, 2), _SUBLANES))
    tile_rows = max(_SUBLANES, (tile_rows // _SUBLANES) * _SUBLANES)

    grid = (pl.cdiv(rows, tile_rows),)   # ragged last block masked by Pallas

    itemsize = jnp.dtype(dtype).itemsize
    out2d = pl.pallas_call(
        _threshold_kernel,
        out_shape=jax.ShapeDtypeStruct((rows, _LANES), dtype),
        grid=grid,
        in_specs=[pl.BlockSpec((tile_rows, _LANES), lambda i: (i, 0))],
        out_specs=pl.BlockSpec((tile_rows, _LANES), lambda i: (i, 0)),
        compiler_params=pltpu.CompilerParams(
            dimension_semantics=("parallel",),
            # 2 arrays x 2 buffers x 4 MiB = 16 MiB; stay above v5e's 16 MiB
            # default scoped limit while well under v7x's 64 MiB physical VMEM.
            vmem_limit_bytes=32 << 20,
        ),
        cost_estimate=pl.CostEstimate(
            flops=bulk_n, transcendentals=0,
            bytes_accessed=2 * bulk_n * itemsize),
    )(x2d)

    if tail_n == 0:
        # No-pad fast path: free reshape, no slice / extra HBM round trip.
        return out2d.reshape(orig_shape)

    # Ragged tail (< 4096 elems): compute with plain XLA instead of padding
    # the whole input and slicing the whole output back.
    tail = flat[bulk_n:]
    tail_out = jnp.where(tail > THRESHOLD, tail, jnp.asarray(VALUE, dtype))
    return jnp.concatenate([out2d.reshape(-1), tail_out]).reshape(orig_shape)


if __name__ == "__main__":
    key = jax.random.PRNGKey(0)
    k0, k1, k2 = jax.random.split(key, 3)

    def ref(v):
        return jnp.where(v > THRESHOLD, v, jnp.asarray(VALUE, v.dtype))

    # 1) Same shape as the reference PyTorch script (tiny-input bypass path).
    x_small = jax.random.normal(k0, (1, 3, 10, 10), dtype=jnp.float32)
    y_small = threshold_pallas(x_small)
    jax.block_until_ready(y_small)
    assert y_small.shape == x_small.shape and y_small.dtype == x_small.dtype
    assert jnp.allclose(y_small, ref(x_small)), "bypass-path mismatch"

    # 2) Kernel path, chunk-aligned size (no tail), 2-step parallel grid.
    x_mid = jax.random.normal(k1, (2, 4, 128, 128), dtype=jnp.float32)
    y_mid = threshold_pallas(x_mid)
    jax.block_until_ready(y_mid)
    assert y_mid.shape == x_mid.shape and y_mid.dtype == x_mid.dtype
    assert jnp.allclose(y_mid, ref(x_mid)), "aligned kernel-path mismatch"

    # 3) Kernel path with a ragged last block plus a small XLA tail.
    x_ragged = jax.random.normal(k2, (1, 5, 120, 120), dtype=jnp.float32)
    y_ragged = threshold_pallas(x_ragged)
    jax.block_until_ready(y_ragged)
    assert y_ragged.shape == x_ragged.shape and y_ragged.dtype == x_ragged.dtype
    assert jnp.allclose(y_ragged, ref(x_ragged)), "ragged kernel-path mismatch"

    print("KERNEL_OK")
</pallas_src>

<mosaic_0001>
module attributes {stable_mosaic.version = 11 : i64} {
  func.func @_threshold_kernel(%arg0: i32, %arg1: memref<128x512xf32, #tpu.memory_space<vmem>>, %arg2: memref<128x512xf32, #tpu.memory_space<vmem>>) attributes {dimension_semantics = [#tpu.dimension_semantics<parallel>], iteration_bounds = array<i64: 2>, scalar_prefetch = 0 : i64, scratch_operands = 0 : i64, tpu.core_type = #tpu.core_type<tc>, window_params = [{transform_indices = @transform_0, window_bounds = array<i64: 128, 512>}, {transform_indices = @transform_1, window_bounds = array<i64: 128, 512>}]} {
    %c0 = arith.constant 0 : index
    %c0_0 = arith.constant 0 : index
    %0 = vector.load %arg1[%c0, %c0_0] : memref<128x512xf32, #tpu.memory_space<vmem>>, vector<128x512xf32>
    %cst = arith.constant 1.000000e-01 : f32
    %1 = vector.broadcast %cst : f32 to vector<128x512xf32>
    %2 = arith.cmpf ogt, %0, %1 : vector<128x512xf32>
    %cst_1 = arith.constant 2.000000e+01 : f32
    %3 = vector.broadcast %cst_1 : f32 to vector<128x512xf32>
    %4 = arith.select %2, %0, %3 : vector<128x512xi1>, vector<128x512xf32>
    %c0_2 = arith.constant 0 : index
    %c0_3 = arith.constant 0 : index
    %5 = vector.load %arg2[%c0_2, %c0_3] : memref<128x512xf32, #tpu.memory_space<vmem>>, vector<128x512xf32>
    tpu.vector_store %arg2[%c0_2, %c0_3], %4 {strides = array<i32>} : memref<128x512xf32, #tpu.memory_space<vmem>>, vector<128x512xf32>,
    return
  }
  func.func @transform_0(%arg0: i32) -> (i32, i32) {
    %c0_i32 = arith.constant 0 : i32
    %c0_i32_0 = arith.constant 0 : i32
    return %arg0, %c0_i32 : i32, i32
  }
  func.func @transform_1(%arg0: i32) -> (i32, i32) {
    %c0_i32 = arith.constant 0 : i32
    %c0_i32_0 = arith.constant 0 : i32
    return %arg0, %c0_i32 : i32, i32
  }
}

</mosaic_0001>

<bundles_post_ra>
// kernel: tpu_custom_call.1
= control target key start
LH: loop header
LB: loop body
LE: loop exit
PB: predicated region body
PF: predicated region fallthrough
CT: control target
= control target key end

     0   :  { %6 = vsyncpa [#allocation3], 0  ;;  %s965_s0 = inlined_call_operand.hbm [shape: f32[256,512], index: 0, kind: input, shape index: {}]   ;;  %s966_s1 = inlined_call_operand.hbm [shape: f32[256,512], index: 1, kind: output, shape index: {}]  }
   0x1   :  { %8 = vsyncpa [#allocation3 + $0x1], 0 }
   0x2   :  { %9 = vsyncpa [#allocation4], 0 }
   0x3   :  { %11 = vsyncpa [#allocation4 + $0x1], 0  ;;  %s666_s6 = smov 0   ;;  %s668_s7 = smov 0  }
   0x4   :  { %s670_s8 = smov 0   ;;  %s672_s9 = smov 0  }
   0x5 LB: > { %s687_s10 = sadd.s32 4294967295, %s648_s9   ;;  %s482_s11 = sadd.s32 4294967294, %s648_s9   ;;  %s648_s9 = sphi %s672_s9, %s979_s9   ;;  %s644_s8 = sphi %s670_s8, %s978_s8   ;;  %s640_s7 = sphi %s668_s7, %s977_s7   ;;  %s636_s6 = sphi %s666_s6, %s976_s6  }
   0x6   : > { %s691_s12 = sadd.s32 1, %s648_s9   ;;  %s24_s13 = sadd.s32 1, %s644_s8 }
   0x7   : > { %s21_s14 = ssub.s32 %s648_s9, %s691_s12  ;;  %p31_p0 = scmp.ne.s32.totalorder %s644_s8, %s640_s7 }
   0x8   : > { %p22_p1 = scmp.eq.s32.totalorder %s21_s14, 0  ;;  %p32_p2 = scmp.eq.s32.totalorder %s648_s9, 0 }
   0x9   : > { %p37_p3 = scmp.ne.s32.totalorder %s640_s7, %s636_s6  ;;  %p38_p4 = scmp.eq.s32.totalorder %s687_s10, 0 }
   0xa   : > { %s703_s15 = scalar_select %p22_p1, %s644_s8, %s24_s13  }
   0xb   : > { %p705_p5 = por %p32_p2, %p31_p0  ;;  %p709_p6 = por %p38_p4, %p37_p3 }
   0xc   : > { %p61_p7 = scmp.eq.s32.totalorder %s687_s10, 1  ;;  %p67_p8 = scmp.eq.s32.totalorder %s482_s11, 1 }
   0xd   : > { %p514_p10 = scmp.lt.s32.totalorder %s648_s9, 2  ;;  %s87_s20 = sand.u32 1, %s644_s8  }
   0xe   : > { %p716_p11 = por %p61_p7, %p31_p0  ;;  %p720_p12 = por %p67_p8, %p37_p3 }
   0xf   : > { %s499_s21 = sshll.u32 %s648_s9, 13  ;;  %s485_s22 = sshll.u32 %s87_s20, 9 }
  0x10   : > { %s970_s18 = scalar_select %p716_p11, 1, 0 }
  0x11   : > { %s971_s19 = scalar_select %p720_p12, 1, 0 }
  0x12   : > { %s729_s25 = scalar_lea.hbm %s965_s0, %s499_s21  ;;  %s91_s26 = scalar_lea.vmem [#allocation2], %s485_s22 }
  0x13   : > { %s99_s27 = sshll.u32 %s91_s26, 4  ;;  %p733_p13 = pnand %p514_p10, %p705_p5  ;;  %s737_s27 = int_to_ptr.vmem [resolvable:$true] %s99_s27 }
  0x14   : > { %s739_s29 = scalar_lea.sflag [#allocation3], %s87_s20  ;;  %s552_s30 = scalar_lea.hbm %s729_s25, 8192 }
  0x15   : > { %p553_p0 = scmp.ne.s32.totalorder %s729_s25, %s552_s30  ;;  %p554_p1 = pneg %p733_p13 }
  0x16   : > { %s557_s4 = scalar_lea.hbm %s965_s0, 16384  ;;  %p558_p4 = scmp.lt.u32.totalorder %s729_s25, %s965_s0 }
  0x17   : > { %p555_p2 = pnand %p554_p1, %p553_p0  ;;  %p559_p5 = scmp.lt.u32.totalorder %s557_s4, %s552_s30 }
  0x18   : > { %p561_p8 = scmp.lt.u32.totalorder %s552_s30, %s729_s25 }
  0x19   : > { %p556_p3 = pneg %p555_p2  ;;  %p560_p7 = por %p559_p5, %p558_p4 }
  0x1b   : > { %p562_p10 = por %p561_p8, %p560_p7 }
  0x1d   : > { %p563_p9 = pnand %p562_p10, %p556_p3 }
  0x1f   : > { %566 = shalt.err (!%p563_p9)
}
  0x20   : > { %s567_s13 = scalar_lea.vmem %s737_s27, 8192  ;;  %s650_s14 = smov [#allocation2]  }
  0x21   : > { %p568_p0 = scmp.ne.s32.totalorder %s737_s27, %s567_s13  ;;  %s572_s16 = sshll.u32 %s650_s14, 4  ;;  %s573_s16 = int_to_ptr.vmem [resolvable:$false] %s572_s16 }
  0x22   : > { %s574_s20 = scalar_lea.vmem %s573_s16, 16384  ;;  %p575_p11 = scmp.lt.s32.totalorder %s737_s27, %s573_s16 }
  0x23   : > { %p570_p2 = pnand %p568_p0, %p554_p1  ;;  %p576_p4 = scmp.lt.s32.totalorder %s574_s20, %s567_s13 }
  0x25   : > { %p571_p12 = pneg %p570_p2  ;;  %p577_p5 = por %p576_p4, %p575_p11 }
  0x27   : > { %p578_p7 = pnand %p577_p5, %p571_p12 }
  0x29   : > { %581 = shalt.err (!%p578_p7)
}
  0x2a   : > { %s651_s21 = smov 512   ;;  %s652_s22 = smov 32  }
  0x2b   : > { %509 = dma.hbm_to_vmem [thread:$0]  (!%p733_p13), %s729_s25, 8192, %s737_s27, %s739_s29, %s651_s21, %s651_s21, %s652_s22  }
  0x2c   : > { %p489_p9 = scmp.ge.s32.totalorder %s648_s9, 1  ;;  %p107_p1 = scmp.lt.s32.totalorder %s648_s9, 3 }
  0x2e   : > { %p108_p3 = pnand %p489_p9, %p107_p1 }
  0x2f   : > { %s770_s23 = sand.u32 (!%p108_p3), 1, %s640_s7  }
  0x30   : > { %111 = sbr.rel (%p108_p3) target bundleno = 134 (0x86), region = 24  ;;  %s490_s24 = sshll.u32 (!%p108_p3), %s770_s23, 9 }
  0x31   : > { %s114_s26 = scalar_lea.sflag (!%p108_p3), [#allocation3], %s770_s23  ;;  %s774_s30 = scalar_lea.vmem (!%p108_p3), [#allocation2], %s490_s24 }
  0x37   : > { %627 = dma.done.wait (%p709_p6), %s114_s26, 8192  }
  0x38   : > { %629 = vsyncadd (%p709_p6), %s114_s26, 4294959104  ;;  %v138_v0 = vld [vmem:[%s774_s30] sm:$0xff]  ;;  %v139_v1 = vld [vmem:[%s774_s30 + $0x8] sm:$0xff]  ;;  %s501_s25 = sshll.u32 %s687_s10, 13  ;;  %s784_s27 = scalar_lea.vmem [#allocation5], %s490_s24 }
  0x39   : > { %v140_v2 = vld [vmem:[%s774_s30 + $0x10] sm:$0xff]  ;;  %s409_s28 = sshll.u32 %s784_s27, 4  ;;  %vm202_vm0 = vcmp.gt.f32.partialorder %v138_v0, 0.1  ;;  %vm203_vm1 = vcmp.gt.f32.partialorder %v139_v1, 0.1  ;;  %s913_s2 = scalar_lea.hbm %s966_s1, %s501_s25  ;;  %s917_s28 = int_to_ptr.vmem [resolvable:$true] %s409_s28 }
  0x3a   : > { %vm204_vm2 = vcmp.gt.f32.partialorder %v140_v2, 0.1  ;;  %v266_v3 = vsel %vm202_vm0, %v138_v0, 20.0  ;;  %v267_v4 = vsel %vm203_vm1, %v139_v1, 20.0  ;;  %v141_v6 = vld [vmem:[%s774_s30 + $0x18] sm:$0xff]  ;;  %v142_v7 = vld [vmem:[%s774_s30 + $0x20] sm:$0xff] }
  0x3b   : > { %v268_v5 = vsel %vm204_vm2, %v140_v2, 20.0  ;;  %v143_v8 = vld [vmem:[%s774_s30 + $0x28] sm:$0xff]  ;;  %330 = vst [vmem:[%s784_s27] sm:$0xff] %v266_v3  ;;  %331 = vst [vmem:[%s784_s27 + $0x8] sm:$0xff] %v267_v4  ;;  %vm205_vm3 = vcmp.gt.f32.partialorder %v141_v6, 0.1  ;;  %v144_v12 = vld [vmem:[%s774_s30 + $0x30] sm:$0xff] }
  0x3c   : > { %332 = vst [vmem:[%s784_s27 + $0x10] sm:$0xff] %v268_v5  ;;  %vm206_vm4 = vcmp.gt.f32.partialorder %v142_v7, 0.1  ;;  %vm207_vm5 = vcmp.gt.f32.partialorder %v143_v8, 0.1  ;;  %v269_v9 = vsel %vm205_vm3, %v141_v6, 20.0 }
  0x3d   : > { %v270_v10 = vsel %vm206_vm4, %v142_v7, 20.0  ;;  %v271_v11 = vsel %vm207_vm5, %v143_v8, 20.0  ;;  %v145_v13 = vld [vmem:[%s774_s30 + $0x38] sm:$0xff]  ;;  %v146_v14 = vld [vmem:[%s774_s30 + $0x40] sm:$0xff]  ;;  %333 = vst [vmem:[%s784_s27 + $0x18] sm:$0xff] %v269_v9  ;;  %v147_v18 = vld [vmem:[%s774_s30 + $0x48] sm:$0xff] }
  0x3e   : > { %334 = vst [vmem:[%s784_s27 + $0x20] sm:$0xff] %v270_v10  ;;  %335 = vst [vmem:[%s784_s27 + $0x28] sm:$0xff] %v271_v11  ;;  %vm208_vm6 = vcmp.gt.f32.partialorder %v144_v12, 0.1  ;;  %vm209_vm7 = vcmp.gt.f32.partialorder %v145_v13, 0.1 }
  0x3f   : > { %vm210_vm8 = vcmp.gt.f32.partialorder %v146_v14, 0.1  ;;  %v272_v15 = vsel %vm208_vm6, %v144_v12, 20.0  ;;  %v273_v16 = vsel %vm209_vm7, %v145_v13, 20.0  ;;  %v148_v19 = vld [vmem:[%s774_s30 + $0x50] sm:$0xff]  ;;  %v149_v20 = vld [vmem:[%s774_s30 + $0x58] sm:$0xff] }
  0x40   : > { %v274_v17 = vsel %vm210_vm8, %v146_v14, 20.0  ;;  %336 = vst [vmem:[%s784_s27 + $0x30] sm:$0xff] %v272_v15  ;;  %337 = vst [vmem:[%s784_s27 + $0x38] sm:$0xff] %v273_v16  ;;  %vm211_vm9 = vcmp.gt.f32.partialorder %v147_v18, 0.1  ;;  %v150_v24 = vld [vmem:[%s774_s30 + $0x60] sm:$0xff] }
  0x41   : > { %338 = vst [vmem:[%s784_s27 + $0x40] sm:$0xff] %v274_v17  ;;  %vm212_vm10 = vcmp.gt.f32.partialorder %v148_v19, 0.1  ;;  %vm213_vm11 = vcmp.gt.f32.partialorder %v149_v20, 0.1  ;;  %v275_v21 = vsel %vm211_vm9, %v147_v18, 20.0 }
  0x42   : > { %v276_v22 = vsel %vm212_vm10, %v148_v19, 20.0  ;;  %v277_v23 = vsel %vm213_vm11, %v149_v20, 20.0  ;;  %v151_v25 = vld [vmem:[%s774_s30 + $0x68] sm:$0xff]  ;;  %v152_v26 = vld [vmem:[%s774_s30 + $0x70] sm:$0xff]  ;;  %339 = vst [vmem:[%s784_s27 + $0x48] sm:$0xff] %v275_v21  ;;  %v153_v30 = vld [vmem:[%s774_s30 + $0x78] sm:$0xff] }
  0x43   : > { %340 = vst [vmem:[%s784_s27 + $0x50] sm:$0xff] %v276_v22  ;;  %341 = vst [vmem:[%s784_s27 + $0x58] sm:$0xff] %v277_v23  ;;  %vm214_vm12 = vcmp.gt.f32.partialorder %v150_v24, 0.1  ;;  %vm215_vm13 = vcmp.gt.f32.partialorder %v151_v25, 0.1 }
  0x44   : > { %vm216_vm14 = vcmp.gt.f32.partialorder %v152_v26, 0.1  ;;  %v278_v27 = vsel %vm214_vm12, %v150_v24, 20.0  ;;  %v279_v28 = vsel %vm215_vm13, %v151_v25, 20.0  ;;  %v154_v31 = vld [vmem:[%s774_s30 + $0x80] sm:$0xff]  ;;  %v155_v32 = vld [vmem:[%s774_s30 + $0x88] sm:$0xff] }
  0x45   : > { %v280_v29 = vsel %vm216_vm14, %v152_v26, 20.0  ;;  %342 = vst [vmem:[%s784_s27 + $0x60] sm:$0xff] %v278_v27  ;;  %343 = vst [vmem:[%s784_s27 + $0x68] sm:$0xff] %v279_v28  ;;  %vm217_vm15 = vcmp.gt.f32.partialorder %v153_v30, 0.1  ;;  %v156_v36 = vld [vmem:[%s774_s30 + $0x90] sm:$0xff] }
  0x46   : > { %344 = vst [vmem:[%s784_s27 + $0x70] sm:$0xff] %v280_v29  ;;  %vm218_vm0 = vcmp.gt.f32.partialorder %v154_v31, 0.1  ;;  %vm219_vm1 = vcmp.gt.f32.partialorder %v155_v32, 0.1  ;;  %v281_v33 = vsel %vm217_vm15, %v153_v30, 20.0 }
  0x47   : > { %v282_v34 = vsel %vm218_vm0, %v154_v31, 20.0  ;;  %v283_v35 = vsel %vm219_vm1, %v155_v32, 20.0  ;;  %v157_v37 = vld [vmem:[%s774_s30 + $0x98] sm:$0xff]  ;;  %v158_v38 = vld [vmem:[%s774_s30 + $0xa0] sm:$0xff]  ;;  %345 = vst [vmem:[%s784_s27 + $0x78] sm:$0xff] %v281_v33  ;;  %v159_v42 = vld [vmem:[%s774_s30 + $0xa8] sm:$0xff] }
  0x48   : > { %346 = vst [vmem:[%s784_s27 + $0x80] sm:$0xff] %v282_v34  ;;  %347 = vst [vmem:[%s784_s27 + $0x88] sm:$0xff] %v283_v35  ;;  %vm220_vm2 = vcmp.gt.f32.partialorder %v156_v36, 0.1  ;;  %vm221_vm3 = vcmp.gt.f32.partialorder %v157_v37, 0.1 }
  0x49   : > { %vm222_vm4 = vcmp.gt.f32.partialorder %v158_v38, 0.1  ;;  %v284_v39 = vsel %vm220_vm2, %v156_v36, 20.0  ;;  %v285_v40 = vsel %vm221_vm3, %v157_v37, 20.0  ;;  %v160_v43 = vld [vmem:[%s774_s30 + $0xb0] sm:$0xff]  ;;  %v161_v44 = vld [vmem:[%s774_s30 + $0xb8] sm:$0xff] }
  0x4a   : > { %v286_v41 = vsel %vm222_vm4, %v158_v38, 20.0  ;;  %348 = vst [vmem:[%s784_s27 + $0x90] sm:$0xff] %v284_v39  ;;  %349 = vst [vmem:[%s784_s27 + $0x98] sm:$0xff] %v285_v40  ;;  %vm223_vm5 = vcmp.gt.f32.partialorder %v159_v42, 0.1  ;;  %v162_v48 = vld [vmem:[%s774_s30 + $0xc0] sm:$0xff] }
  0x4b   : > { %350 = vst [vmem:[%s784_s27 + $0xa0] sm:$0xff] %v286_v41  ;;  %vm224_vm6 = vcmp.gt.f32.partialorder %v160_v43, 0.1  ;;  %vm225_vm7 = vcmp.gt.f32.partialorder %v161_v44, 0.1  ;;  %v287_v45 = vsel %vm223_vm5, %v159_v42, 20.0 }
  0x4c   : > { %v288_v46 = vsel %vm224_vm6, %v160_v43, 20.0  ;;  %v289_v47 = vsel %vm225_vm7, %v161_v44, 20.0  ;;  %v163_v49 = vld [vmem:[%s774_s30 + $0xc8] sm:$0xff]  ;;  %v164_v50 = vld [vmem:[%s774_s30 + $0xd0] sm:$0xff]  ;;  %351 = vst [vmem:[%s784_s27 + $0xa8] sm:$0xff] %v287_v45  ;;  %v165_v54 = vld [vmem:[%s774_s30 + $0xd8] sm:$0xff] }
  0x4d   : > { %352 = vst [vmem:[%s784_s27 + $0xb0] sm:$0xff] %v288_v46  ;;  %353 = vst [vmem:[%s784_s27 + $0xb8] sm:$0xff] %v289_v47  ;;  %vm226_vm8 = vcmp.gt.f32.partialorder %v162_v48, 0.1  ;;  %vm227_vm9 = vcmp.gt.f32.partialorder %v163_v49, 0.1 }
  0x4e   : > { %vm228_vm10 = vcmp.gt.f32.partialorder %v164_v50, 0.1  ;;  %v290_v51 = vsel %vm226_vm8, %v162_v48, 20.0  ;;  %v291_v52 = vsel %vm227_vm9, %v163_v49, 20.0  ;;  %v166_v55 = vld [vmem:[%s774_s30 + $0xe0] sm:$0xff]  ;;  %v167_v56 = vld [vmem:[%s774_s30 + $0xe8] sm:$0xff] }
  0x4f   : > { %v292_v53 = vsel %vm228_vm10, %v164_v50, 20.0  ;;  %354 = vst [vmem:[%s784_s27 + $0xc0] sm:$0xff] %v290_v51  ;;  %355 = vst [vmem:[%s784_s27 + $0xc8] sm:$0xff] %v291_v52  ;;  %vm229_vm11 = vcmp.gt.f32.partialorder %v165_v54, 0.1  ;;  %v168_v60 = vld [vmem:[%s774_s30 + $0xf0] sm:$0xff] }
  0x50   : > { %356 = vst [vmem:[%s784_s27 + $0xd0] sm:$0xff] %v292_v53  ;;  %vm230_vm12 = vcmp.gt.f32.partialorder %v166_v55, 0.1  ;;  %vm231_vm13 = vcmp.gt.f32.partialorder %v167_v56, 0.1  ;;  %v293_v57 = vsel %vm229_vm11, %v165_v54, 20.0 }
  0x51   : > { %v294_v58 = vsel %vm230_vm12, %v166_v55, 20.0  ;;  %v295_v59 = vsel %vm231_vm13, %v167_v56, 20.0  ;;  %v169_v61 = vld [vmem:[%s774_s30 + $0xf8] sm:$0xff]  ;;  %v170_v62 = vld [vmem:[%s774_s30 + $0x100] sm:$0xff]  ;;  %357 = vst [vmem:[%s784_s27 + $0xd8] sm:$0xff] %v293_v57  ;;  %v171_v2 = vld [vmem:[%s774_s30 + $0x108] sm:$0xff] }
  0x52   : > { %358 = vst [vmem:[%s784_s27 + $0xe0] sm:$0xff] %v294_v58  ;;  %359 = vst [vmem:[%s784_s27 + $0xe8] sm:$0xff] %v295_v59  ;;  %vm232_vm14 = vcmp.gt.f32.partialorder %v168_v60, 0.1  ;;  %vm233_vm15 = vcmp.gt.f32.partialorder %v169_v61, 0.1 }
  0x53   : > { %vm234_vm0 = vcmp.gt.f32.partialorder %v170_v62, 0.1  ;;  %v296_v63 = vsel %vm232_vm14, %v168_v60, 20.0  ;;  %v297_v0 = vsel %vm233_vm15, %v169_v61, 20.0  ;;  %v172_v3 = vld [vmem:[%s774_s30 + $0x110] sm:$0xff]  ;;  %v173_v4 = vld [vmem:[%s774_s30 + $0x118] sm:$0xff] }
  0x54   : > { %v298_v1 = vsel %vm234_vm0, %v170_v62, 20.0  ;;  %360 = vst [vmem:[%s784_s27 + $0xf0] sm:$0xff] %v296_v63  ;;  %361 = vst [vmem:[%s784_s27 + $0xf8] sm:$0xff] %v297_v0  ;;  %vm235_vm1 = vcmp.gt.f32.partialorder %v171_v2, 0.1  ;;  %v174_v8 = vld [vmem:[%s774_s30 + $0x120] sm:$0xff] }
  0x55   : > { %362 = vst [vmem:[%s784_s27 + $0x100] sm:$0xff] %v298_v1  ;;  %vm236_vm2 = vcmp.gt.f32.partialorder %v172_v3, 0.1  ;;  %vm237_vm3 = vcmp.gt.f32.partialorder %v173_v4, 0.1  ;;  %v299_v5 = vsel %vm235_vm1, %v171_v2, 20.0 }
  0x56   : > { %v300_v6 = vsel %vm236_vm2, %v172_v3, 20.0  ;;  %v301_v7 = vsel %vm237_vm3, %v173_v4, 20.0  ;;  %v175_v9 = vld [vmem:[%s774_s30 + $0x128] sm:$0xff]  ;;  %v176_v10 = vld [vmem:[%s774_s30 + $0x130] sm:$0xff]  ;;  %363 = vst [vmem:[%s784_s27 + $0x108] sm:$0xff] %v299_v5  ;;  %v177_v14 = vld [vmem:[%s774_s30 + $0x138] sm:$0xff] }
  0x57   : > { %364 = vst [vmem:[%s784_s27 + $0x110] sm:$0xff] %v300_v6  ;;  %365 = vst [vmem:[%s784_s27 + $0x118] sm:$0xff] %v301_v7  ;;  %vm238_vm4 = vcmp.gt.f32.partialorder %v174_v8, 0.1  ;;  %vm239_vm5 = vcmp.gt.f32.partialorder %v175_v9, 0.1 }
  0x58   : > { %vm240_vm6 = vcmp.gt.f32.partialorder %v176_v10, 0.1  ;;  %v302_v11 = vsel %vm238_vm4, %v174_v8, 20.0  ;;  %v303_v12 = vsel %vm239_vm5, %v175_v9, 20.0  ;;  %v178_v15 = vld [vmem:[%s774_s30 + $0x140] sm:$0xff]  ;;  %v179_v16 = vld [vmem:[%s774_s30 + $0x148] sm:$0xff] }
  0x59   : > { %v304_v13 = vsel %vm240_vm6, %v176_v10, 20.0  ;;  %366 = vst [vmem:[%s784_s27 + $0x120] sm:$0xff] %v302_v11  ;;  %367 = vst [vmem:[%s784_s27 + $0x128] sm:$0xff] %v303_v12  ;;  %vm241_vm7 = vcmp.gt.f32.partialorder %v177_v14, 0.1  ;;  %v180_v20 = vld [vmem:[%s774_s30 + $0x150] sm:$0xff] }
  0x5a   : > { %368 = vst [vmem:[%s784_s27 + $0x130] sm:$0xff] %v304_v13  ;;  %vm242_vm8 = vcmp.gt.f32.partialorder %v178_v15, 0.1  ;;  %vm243_vm9 = vcmp.gt.f32.partialorder %v179_v16, 0.1  ;;  %v305_v17 = vsel %vm241_vm7, %v177_v14, 20.0 }
  0x5b   : > { %v306_v18 = vsel %vm242_vm8, %v178_v15, 20.0  ;;  %v307_v19 = vsel %vm243_vm9, %v179_v16, 20.0  ;;  %v181_v21 = vld [vmem:[%s774_s30 + $0x158] sm:$0xff]  ;;  %v182_v22 = vld [vmem:[%s774_s30 + $0x160] sm:$0xff]  ;;  %369 = vst [vmem:[%s784_s27 + $0x138] sm:$0xff] %v305_v17  ;;  %v183_v26 = vld [vmem:[%s774_s30 + $0x168] sm:$0xff] }
  0x5c   : > { %370 = vst [vmem:[%s784_s27 + $0x140] sm:$0xff] %v306_v18  ;;  %371 = vst [vmem:[%s784_s27 + $0x148] sm:$0xff] %v307_v19  ;;  %vm244_vm10 = vcmp.gt.f32.partialorder %v180_v20, 0.1  ;;  %vm245_vm11 = vcmp.gt.f32.partialorder %v181_v21, 0.1 }
  0x5d   : > { %vm246_vm12 = vcmp.gt.f32.partialorder %v182_v22, 0.1  ;;  %v308_v23 = vsel %vm244_vm10, %v180_v20, 20.0  ;;  %v309_v24 = vsel %vm245_vm11, %v181_v21, 20.0  ;;  %v184_v27 = vld [vmem:[%s774_s30 + $0x170] sm:$0xff]  ;;  %v185_v28 = vld [vmem:[%s774_s30 + $0x178] sm:$0xff] }
  0x5e   : > { %v310_v25 = vsel %vm246_vm12, %v182_v22, 20.0  ;;  %372 = vst [vmem:[%s784_s27 + $0x150] sm:$0xff] %v308_v23  ;;  %373 = vst [vmem:[%s784_s27 + $0x158] sm:$0xff] %v309_v24  ;;  %vm247_vm13 = vcmp.gt.f32.partialorder %v183_v26, 0.1  ;;  %v186_v32 = vld [vmem:[%s774_s30 + $0x180] sm:$0xff] }
  0x5f   : > { %374 = vst [vmem:[%s784_s27 + $0x160] sm:$0xff] %v310_v25  ;;  %vm248_vm14 = vcmp.gt.f32.partialorder %v184_v27, 0.1  ;;  %vm249_vm15 = vcmp.gt.f32.partialorder %v185_v28, 0.1  ;;  %v311_v29 = vsel %vm247_vm13, %v183_v26, 20.0 }
  0x60   : > { %v312_v30 = vsel %vm248_vm14, %v184_v27, 20.0  ;;  %v313_v31 = vsel %vm249_vm15, %v185_v28, 20.0  ;;  %v187_v33 = vld [vmem:[%s774_s30 + $0x188] sm:$0xff]  ;;  %v188_v34 = vld [vmem:[%s774_s30 + $0x190] sm:$0xff]  ;;  %375 = vst [vmem:[%s784_s27 + $0x168] sm:$0xff] %v311_v29  ;;  %v189_v38 = vld [vmem:[%s774_s30 + $0x198] sm:$0xff] }
  0x61   : > { %376 = vst [vmem:[%s784_s27 + $0x170] sm:$0xff] %v312_v30  ;;  %377 = vst [vmem:[%s784_s27 + $0x178] sm:$0xff] %v313_v31  ;;  %vm250_vm0 = vcmp.gt.f32.partialorder %v186_v32, 0.1  ;;  %vm251_vm1 = vcmp.gt.f32.partialorder %v187_v33, 0.1 }
  0x62   : > { %vm252_vm2 = vcmp.gt.f32.partialorder %v188_v34, 0.1  ;;  %v314_v35 = vsel %vm250_vm0, %v186_v32, 20.0  ;;  %v315_v36 = vsel %vm251_vm1, %v187_v33, 20.0  ;;  %v190_v39 = vld [vmem:[%s774_s30 + $0x1a0] sm:$0xff]  ;;  %v191_v40 = vld [vmem:[%s774_s30 + $0x1a8] sm:$0xff] }
  0x63   : > { %v316_v37 = vsel %vm252_vm2, %v188_v34, 20.0  ;;  %378 = vst [vmem:[%s784_s27 + $0x180] sm:$0xff] %v314_v35  ;;  %379 = vst [vmem:[%s784_s27 + $0x188] sm:$0xff] %v315_v36  ;;  %vm253_vm3 = vcmp.gt.f32.partialorder %v189_v38, 0.1  ;;  %v192_v44 = vld [vmem:[%s774_s30 + $0x1b0] sm:$0xff] }
  0x64   : > { %380 = vst [vmem:[%s784_s27 + $0x190] sm:$0xff] %v316_v37  ;;  %vm254_vm4 = vcmp.gt.f32.partialorder %v190_v39, 0.1  ;;  %vm255_vm5 = vcmp.gt.f32.partialorder %v191_v40, 0.1  ;;  %v317_v41 = vsel %vm253_vm3, %v189_v38, 20.0 }
  0x65   : > { %v318_v42 = vsel %vm254_vm4, %v190_v39, 20.0  ;;  %v319_v43 = vsel %vm255_vm5, %v191_v40, 20.0  ;;  %v193_v45 = vld [vmem:[%s774_s30 + $0x1b8] sm:$0xff]  ;;  %v194_v46 = vld [vmem:[%s774_s30 + $0x1c0] sm:$0xff]  ;;  %381 = vst [vmem:[%s784_s27 + $0x198] sm:$0xff] %v317_v41  ;;  %v195_v50 = vld [vmem:[%s774_s30 + $0x1c8] sm:$0xff] }
  0x66   : > { %382 = vst [vmem:[%s784_s27 + $0x1a0] sm:$0xff] %v318_v42  ;;  %383 = vst [vmem:[%s784_s27 + $0x1a8] sm:$0xff] %v319_v43  ;;  %vm256_vm6 = vcmp.gt.f32.partialorder %v192_v44, 0.1  ;;  %vm257_vm7 = vcmp.gt.f32.partialorder %v193_v45, 0.1 }
  0x67   : > { %vm258_vm8 = vcmp.gt.f32.partialorder %v194_v46, 0.1  ;;  %v320_v47 = vsel %vm256_vm6, %v192_v44, 20.0  ;;  %v321_v48 = vsel %vm257_vm7, %v193_v45, 20.0  ;;  %v196_v51 = vld [vmem:[%s774_s30 + $0x1d0] sm:$0xff]  ;;  %v197_v52 = vld [vmem:[%s774_s30 + $0x1d8] sm:$0xff] }
  0x68   : > { %v322_v49 = vsel %vm258_vm8, %v194_v46, 20.0  ;;  %384 = vst [vmem:[%s784_s27 + $0x1b0] sm:$0xff] %v320_v47  ;;  %385 = vst [vmem:[%s784_s27 + $0x1b8] sm:$0xff] %v321_v48  ;;  %vm259_vm9 = vcmp.gt.f32.partialorder %v195_v50, 0.1  ;;  %v198_v56 = vld [vmem:[%s774_s30 + $0x1e0] sm:$0xff] }
  0x69   : > { %386 = vst [vmem:[%s784_s27 + $0x1c0] sm:$0xff] %v322_v49  ;;  %vm260_vm10 = vcmp.gt.f32.partialorder %v196_v51, 0.1  ;;  %vm261_vm11 = vcmp.gt.f32.partialorder %v197_v52, 0.1  ;;  %v323_v53 = vsel %vm259_vm9, %v195_v50, 20.0 }
  0x6a   : > { %v324_v54 = vsel %vm260_vm10, %v196_v51, 20.0  ;;  %v325_v55 = vsel %vm261_vm11, %v197_v52, 20.0  ;;  %v199_v57 = vld [vmem:[%s774_s30 + $0x1e8] sm:$0xff]  ;;  %v200_v58 = vld [vmem:[%s774_s30 + $0x1f0] sm:$0xff]  ;;  %387 = vst [vmem:[%s784_s27 + $0x1c8] sm:$0xff] %v323_v53  ;;  %v201_v62 = vld [vmem:[%s774_s30 + $0x1f8] sm:$0xff] }
  0x6b   : > { %388 = vst [vmem:[%s784_s27 + $0x1d0] sm:$0xff] %v324_v54  ;;  %389 = vst [vmem:[%s784_s27 + $0x1d8] sm:$0xff] %v325_v55  ;;  %vm262_vm12 = vcmp.gt.f32.partialorder %v198_v56, 0.1  ;;  %vm263_vm13 = vcmp.gt.f32.partialorder %v199_v57, 0.1 }
  0x6c   : > { %vm264_vm14 = vcmp.gt.f32.partialorder %v200_v58, 0.1  ;;  %v326_v59 = vsel %vm262_vm12, %v198_v56, 20.0  ;;  %v327_v60 = vsel %vm263_vm13, %v199_v57, 20.0  ;;  %vm265_vm15 = vcmp.gt.f32.partialorder %v201_v62, 0.1 }
  0x6d   : > { %v328_v61 = vsel %vm264_vm14, %v200_v58, 20.0  ;;  %390 = vst [vmem:[%s784_s27 + $0x1e0] sm:$0xff] %v326_v59  ;;  %391 = vst [vmem:[%s784_s27 + $0x1e8] sm:$0xff] %v327_v60  ;;  %v329_v63 = vsel %vm265_vm15, %v201_v62, 20.0  ;;  %s395_s3 = scalar_lea.sflag [#allocation4], %s770_s23  ;;  %s582_s4 = scalar_lea.vmem %s917_s28, 8192 }
  0x6e   : > { %392 = vst [vmem:[%s784_s27 + $0x1f0] sm:$0xff] %v328_v61  ;;  %393 = vst [vmem:[%s784_s27 + $0x1f8] sm:$0xff] %v329_v63  ;;  %p583_p6 = scmp.ne.s32.totalorder %s917_s28, %s582_s4  ;;  %p973_p11 = scmp.ne.s32.totalorder %s970_s18, 0 }
  0x6f   : > { %s653_s10 = smov [#allocation5]  }
  0x70   : > { %p584_p12 = pnand %p583_p6, %p973_p11  ;;  %s586_s5 = sshll.u32 %s653_s10, 4  ;;  %s587_s5 = int_to_ptr.vmem [resolvable:$false] %s586_s5 }
  0x71   : > { %s588_s11 = scalar_lea.vmem %s587_s5, 16384  ;;  %p589_p8 = scmp.lt.s32.totalorder %s917_s28, %s587_s5 }
  0x72   : > { %p585_p13 = pneg %p584_p12  ;;  %p590_p10 = scmp.lt.s32.totalorder %s588_s11, %s582_s4 }
  0x74   : > { %p591_p0 = por %p590_p10, %p589_p8 }
  0x76   : > { %p592_p2 = pnand %p591_p0, %p585_p13 }
  0x78   : > { %595 = shalt.err (!%p592_p2)
}
  0x79   : > { %s596_s13 = scalar_lea.hbm %s913_s2, 8192  ;;  %s600_s20 = scalar_lea.hbm %s966_s1, 16384 }
  0x7a   : > { %p597_p4 = scmp.ne.s32.totalorder %s913_s2, %s596_s13  ;;  %p601_p9 = scmp.lt.u32.totalorder %s913_s2, %s966_s1 }
  0x7b   : > { %p602_p1 = scmp.lt.u32.totalorder %s600_s20, %s596_s13  ;;  %p604_p6 = scmp.lt.u32.totalorder %s596_s13, %s913_s2 }
  0x7c   : > { %p598_p5 = pnand %p597_p4, %p973_p11 }
  0x7d   : > { %p603_p3 = por %p602_p1, %p601_p9 }
  0x7e   : > { %p599_p7 = pneg %p598_p5 }
  0x7f   : > { %p605_p12 = por %p604_p6, %p603_p3 }
  0x81   : > { %p606_p13 = pnand %p605_p12, %p599_p7 }
  0x83   : > { %609 = shalt.err (!%p606_p13)
}
  0x84   : > { %s654_s24 = smov 512   ;;  %s655_s26 = smov 32  }
  0x85   : > { %504 = dma.vmem_to_hbm [thread:$0]  (%p973_p11), %s917_s28, 8192, %s913_s2, %s395_s3, %s654_s24, %s654_s24, %s655_s26  }
  0x86 PF: > { %s424_s30 = sand.u32 1, %s636_s6   ;;  %p974_p8 = scmp.ne.s32.totalorder %s971_s19, 0 }
  0x87   : > { %p975_p10 = scmp.ge.s32.totalorder %s648_s9, 2  ;;  %s425_s25 = scalar_lea.sflag [#allocation4], %s424_s30 }
  0x89   : > { %p511_p0 = pnand %p975_p10, %p974_p8 }
  0x8b   : > { %631 = dma.done.wait (!%p511_p0), %s425_s25, 8192  }
  0x8c   : > { %633 = vsyncadd (!%p511_p0), %s425_s25, 4294959104  ;;  %p14_p2 = scmp.ge.s32.totalorder %s691_s12, 4   ;;  %s976_s6 = smov %s640_s7 }
  0x8d   : > { %s977_s7 = smov %s644_s8  ;;  %s978_s8 = smov %s703_s15 }
  0x8e   : > { %s979_s9 = smov %s691_s12  ;;  %16 = sbr.rel (!%p14_p2) target bundleno = 5 (0x5), region = 69 }
  0x95   :  { %430 = vsyncpa [#allocation3], 1 }
  0x96   :  { %432 = vsyncpa [#allocation3 + $0x1], 1 }
  0x97   :  { %433 = vsyncpa [#allocation4], 1 }
  0x98   :  { %435 = vsyncpa [#allocation4 + $0x1], 1 }

</bundles_post_ra>
